<compile_context>
chip_gen: v7x
topology: tpu7x:2x2x1
jax: 0.10.0
libtpu: 0.0.40
codegen_flags: <defaults>
</compile_context>

<pallas_src>
import functools

import jax
import jax.numpy as jnp
from jax.experimental import pallas as pl
from jax.experimental.pallas import tpu as pltpu


def _se_kernel(x_ref, w1t_ref, b1_ref, w2_ref, b2_ref, o_ref, *, inv_hw, use_mxu):
    """Squeeze-excitation for one block of Bt batch elements.

    x_ref   : (Bt, C, HW)  activations, spatial flattened on the lane axis
    w1t_ref : (C, Cr)      first 1x1 conv weight, transposed (torch (Cr, C).T)
    b1_ref  : (1, Cr)
    w2_ref  : (C, Cr)      second 1x1 conv weight (torch layout (C, Cr))
    b2_ref  : (C, 1)
    o_ref   : (Bt, C, HW)
    """
    x = x_ref[...]                                            # (Bt, C, HW), input dtype

    # ---- squeeze: global average pool over spatial (cross-lane reduce) ----
    # f32 accumulation only; the full-tile f32 copy is never kept live.
    avg = jnp.sum(x, axis=-1, dtype=jnp.float32, keepdims=True) * inv_hw   # (Bt, C, 1)

    w1t = w1t_ref[...].astype(jnp.float32)                    # (C, Cr)
    w2 = w2_ref[...].astype(jnp.float32)                      # (C, Cr)
    b1 = b1_ref[...].astype(jnp.float32)                      # (1, Cr)
    b2 = b2_ref[...].astype(jnp.float32)                      # (C, 1)

    # ---- excitation: two tiny FC layers ----
    if use_mxu:
        # Batched rows with real C/Cr widths: run the FCs on the MXU.
        avg2 = jnp.squeeze(avg, axis=-1)                      # (Bt, C)
        h = jnp.dot(avg2, w1t, preferred_element_type=jnp.float32) + b1     # (Bt, Cr)
        h = jnp.maximum(h, 0.0)
        s = jax.lax.dot_general(h, w2, (((1,), (1,)), ((), ())),
                                preferred_element_type=jnp.float32)          # (Bt, C)
        s = s[:, :, None] + b2                                               # (Bt, C, 1)
    else:
        # Tiny Cr: (C, Cr) vregs are nearly empty -> keep it on the VPU/XLU.
        # fc1: h[b, r] = sum_c W1[r, c] * avg[b, c]     (sublane reduction)
        h = jnp.sum(avg * w1t, axis=1) + b1                                  # (Bt, Cr)
        h = jnp.maximum(h, 0.0)                                              # ReLU
        # fc2: s[b, c] = sum_r W2[c, r] * h[b, r]       (lane reduction over Cr)
        s = jnp.sum(h[:, None, :] * w2, axis=-1, keepdims=True) + b2         # (Bt, C, 1)

    # exp goes to the EUP; the divide on a (Bt, C, 1) vector is negligible.
    gate = 1.0 / (1.0 + jnp.exp(-s))                                         # sigmoid

    # ---- scale: per-(batch, channel) gate broadcast across the lane axis ----
    # Gate multiply runs in the input dtype (native bf16 VALU on v6e/v7x).
    o_ref[...] = (x * gate.astype(x.dtype)).astype(o_ref.dtype)


def _pick_block_batch(n, per_elem_bytes, target_bytes=2 << 20):
    """Largest divisor Bt of n with Bt*per_elem <= target and >= 2 grid steps."""
    if n <= 1:
        return 1
    best = 1
    for bt in range(1, n // 2 + 1):          # n // bt >= 2
        if n % bt:
            continue
        if bt * per_elem_bytes > target_bytes:
            continue
        best = max(best, bt)
    return best


def se_module(x, w1, b1, w2, b2):
    """SEModule forward.

    x  : (N, C, H, W)   NCHW activations
    w1 : (Cr, C)        torch Conv2d weight (Cr, C, 1, 1) squeezed
    b1 : (Cr,)
    w2 : (C, Cr)        torch Conv2d weight (C, Cr, 1, 1) squeezed
    b2 : (C,)
    """
    N, C, H, W = x.shape
    Cr = w1.shape[0]
    HW = H * W

    x_flat = x.reshape(N, C, HW)             # lane axis = flattened spatial
    w1t = w1.T                               # (C, Cr)
    b1r = b1.reshape(1, Cr)
    b2r = b2.reshape(C, 1)

    itemsize = jnp.dtype(x.dtype).itemsize
    per_elem = C * HW * itemsize             # bytes of one batch element's tile
    Bt = _pick_block_batch(N, per_elem)
    steps = N // Bt

    # Keep the FCs on the VPU for tiny Cr; MXU only pays off with batched rows
    # and real widths.
    use_mxu = (Bt >= 8 and C >= 128 and Cr >= 16)

    kern = functools.partial(_se_kernel, inv_hw=1.0 / HW, use_mxu=use_mxu)

    # With a long grid of small tiles the DMA issue latency is not hidden by
    # the short compute; a third input buffer closes the exposed-DMA bubble.
    x_spec_kwargs = {}
    if steps >= 4 and Bt * per_elem < (512 << 10):
        x_spec_kwargs["pipeline_mode"] = pl.Buffered(3)

    # Double-buffered input + output tiles plus resident weights.
    est_vmem = 4 * Bt * per_elem + 8 * (2 * C * Cr + C + Cr) + (2 << 20)
    cp_kwargs = dict(dimension_semantics=("parallel",))
    if est_vmem > (32 << 20):
        # TODO(synk): for tiles this large a spatially tiled two-pass variant
        # (squeeze pass producing per-(n,c) means, then a streaming gate pass)
        # keeps VMEM small on v7x (64 MiB physical); single-pass with a raised
        # limit is fine on v5e/v6e (128 MiB).
        cp_kwargs["vmem_limit_bytes"] = int(min(est_vmem, 100 << 20))

    out = pl.pallas_call(
        kern,
        out_shape=jax.ShapeDtypeStruct((N, C, HW), x.dtype),
        grid_spec=pltpu.PrefetchScalarGridSpec(
            num_scalar_prefetch=0,
            grid=(steps,),
            in_specs=[
                pl.BlockSpec((Bt, C, HW), lambda b: (b, 0, 0), **x_spec_kwargs),
                pl.BlockSpec((C, Cr), lambda b: (0, 0)),
                pl.BlockSpec((1, Cr), lambda b: (0, 0)),
                pl.BlockSpec((C, Cr), lambda b: (0, 0)),
                pl.BlockSpec((C, 1), lambda b: (0, 0)),
            ],
            out_specs=pl.BlockSpec((Bt, C, HW), lambda b: (b, 0, 0)),
        ),
        compiler_params=pltpu.CompilerParams(**cp_kwargs),
    )(x_flat, w1t, b1r, w2, b2r)

    return out.reshape(N, C, H, W)


def _reference(x, w1, b1, w2, b2):
    """Pure-JAX reference matching torch AdaptiveAvgPool2d(1) -> 1x1 conv -> ReLU -> 1x1 conv -> Sigmoid -> x * gate."""
    avg = jnp.mean(x, axis=(2, 3), keepdims=True)                        # (N, C, 1, 1)
    h = jnp.einsum("ncij,rc->nrij", avg, w1) + b1.reshape(1, -1, 1, 1)   # (N, Cr, 1, 1)
    h = jnp.maximum(h, 0.0)
    s = jnp.einsum("nrij,cr->ncij", h, w2) + b2.reshape(1, -1, 1, 1)     # (N, C, 1, 1)
    s = jax.nn.sigmoid(s)
    return x * s


if __name__ == "__main__":
    # SEModule(in_channels=32, reduction=16) -> hidden channels Cr = 2
    N, C, H, W = 2, 32, 16, 16
    reduction = 16
    Cr = C // reduction

    key = jax.random.PRNGKey(0)
    kx, kw1, kb1, kw2, kb2 = jax.random.split(key, 5)
    x = jax.random.normal(kx, (N, C, H, W), dtype=jnp.float32)
    w1 = jax.random.normal(kw1, (Cr, C), dtype=jnp.float32) * 0.1
    b1 = jax.random.normal(kb1, (Cr,), dtype=jnp.float32) * 0.1
    w2 = jax.random.normal(kw2, (C, Cr), dtype=jnp.float32) * 0.1
    b2 = jax.random.normal(kb2, (C,), dtype=jnp.float32) * 0.1

    out = jax.block_until_ready(se_module(x, w1, b1, w2, b2))
    ref = jax.block_until_ready(_reference(x, w1, b1, w2, b2))

    assert out.shape == ref.shape, (out.shape, ref.shape)
    assert jnp.allclose(out, ref, atol=1e-5, rtol=1e-5), float(
        jnp.max(jnp.abs(out - ref)))
    print("KERNEL_OK")
</pallas_src>

<mosaic_0001>
module attributes {stable_mosaic.version = 11 : i64} {
  func.func @_se_kernel(%arg0: i32, %arg1: memref<1x32x256xf32, #tpu.memory_space<vmem>>, %arg2: memref<32x2xf32, #tpu.memory_space<vmem>>, %arg3: memref<1x2xf32, #tpu.memory_space<vmem>>, %arg4: memref<32x2xf32, #tpu.memory_space<vmem>>, %arg5: memref<32x1xf32, #tpu.memory_space<vmem>>, %arg6: memref<1x32x256xf32, #tpu.memory_space<vmem>>) attributes {dimension_semantics = [#tpu.dimension_semantics<parallel>], iteration_bounds = array<i64: 2>, scalar_prefetch = 0 : i64, scratch_operands = 0 : i64, tpu.core_type = #tpu.core_type<tc>, window_params = [{transform_indices = @transform_0, window_bounds = array<i64: 1, 32, 256>}, {pipeline_mode = #tpu.pipeline_mode<synchronous>, transform_indices = @transform_1, window_bounds = array<i64: 32, 2>}, {pipeline_mode = #tpu.pipeline_mode<synchronous>, transform_indices = @transform_2, window_bounds = array<i64: 1, 2>}, {pipeline_mode = #tpu.pipeline_mode<synchronous>, transform_indices = @transform_3, window_bounds = array<i64: 32, 2>}, {pipeline_mode = #tpu.pipeline_mode<synchronous>, transform_indices = @transform_4, window_bounds = array<i64: 32, 1>}, {transform_indices = @transform_5, window_bounds = array<i64: 1, 32, 256>}]} {
    %c0 = arith.constant 0 : index
    %c0_0 = arith.constant 0 : index
    %c0_1 = arith.constant 0 : index
    %0 = vector.load %arg1[%c0, %c0_0, %c0_1] : memref<1x32x256xf32, #tpu.memory_space<vmem>>, vector<1x32x256xf32>
    %cst = arith.constant dense<0.000000e+00> : vector<1x32xf32>
    %1 = vector.multi_reduction <add>, %0, %cst [2] : vector<1x32x256xf32> to vector<1x32xf32>
    %2 = vector.shape_cast %1 : vector<1x32xf32> to vector<1x32x1xf32>
    %cst_2 = arith.constant 3.906250e-03 : f32
    %3 = vector.broadcast %cst_2 : f32 to vector<1x32x1xf32>
    %4 = arith.mulf %2, %3 : vector<1x32x1xf32>
    %c0_3 = arith.constant 0 : index
    %c0_4 = arith.constant 0 : index
    %5 = vector.load %arg2[%c0_3, %c0_4] : memref<32x2xf32, #tpu.memory_space<vmem>>, vector<32x2xf32>
    %c0_5 = arith.constant 0 : index
    %c0_6 = arith.constant 0 : index
    %6 = vector.load %arg4[%c0_5, %c0_6] : memref<32x2xf32, #tpu.memory_space<vmem>>, vector<32x2xf32>
    %c0_7 = arith.constant 0 : index
    %c0_8 = arith.constant 0 : index
    %7 = vector.load %arg3[%c0_7, %c0_8] : memref<1x2xf32, #tpu.memory_space<vmem>>, vector<1x2xf32>
    %c0_9 = arith.constant 0 : index
    %c0_10 = arith.constant 0 : index
    %8 = vector.load %arg5[%c0_9, %c0_10] : memref<32x1xf32, #tpu.memory_space<vmem>>, vector<32x1xf32>
    %9 = vector.shape_cast %5 : vector<32x2xf32> to vector<1x32x2xf32>
    %10 = vector.broadcast %4 : vector<1x32x1xf32> to vector<1x32x2xf32>
    %11 = arith.mulf %10, %9 : vector<1x32x2xf32>
    %cst_11 = arith.constant dense<0.000000e+00> : vector<1x2xf32>
    %12 = vector.multi_reduction <add>, %11, %cst_11 [1] : vector<1x32x2xf32> to vector<1x2xf32>
    %13 = arith.addf %12, %7 : vector<1x2xf32>
    %cst_12 = arith.constant 0.000000e+00 : f32
    %14 = vector.broadcast %cst_12 : f32 to vector<1x2xf32>
    %15 = arith.maximumf %13, %14 : vector<1x2xf32>
    %16 = vector.shape_cast %15 : vector<1x2xf32> to vector<1x1x2xf32>
    %17 = vector.shape_cast %6 : vector<32x2xf32> to vector<1x32x2xf32>
    %18 = vector.broadcast %16 : vector<1x1x2xf32> to vector<1x32x2xf32>
    %19 = arith.mulf %18, %17 : vector<1x32x2xf32>
    %cst_13 = arith.constant dense<0.000000e+00> : vector<1x32xf32>
    %20 = vector.multi_reduction <add>, %19, %cst_13 [2] : vector<1x32x2xf32> to vector<1x32xf32>
    %21 = vector.shape_cast %20 : vector<1x32xf32> to vector<1x32x1xf32>
    %22 = vector.shape_cast %8 : vector<32x1xf32> to vector<1x32x1xf32>
    %23 = arith.addf %21, %22 : vector<1x32x1xf32>
    %cst_14 = arith.constant 0.000000e+00 : f32
    %24 = vector.broadcast %cst_14 : f32 to vector<1x32x1xf32>
    %25 = arith.subf %24, %23 : vector<1x32x1xf32>
    %26 = math.exp %25 : vector<1x32x1xf32>
    %cst_15 = arith.constant 1.000000e+00 : f32
    %27 = vector.broadcast %cst_15 : f32 to vector<1x32x1xf32>
    %28 = arith.addf %27, %26 : vector<1x32x1xf32>
    %cst_16 = arith.constant 1.000000e+00 : f32
    %29 = vector.broadcast %cst_16 : f32 to vector<1x32x1xf32>
    %30 = arith.divf %29, %28 : vector<1x32x1xf32>
    %31 = vector.broadcast %30 : vector<1x32x1xf32> to vector<1x32x256xf32>
    %32 = arith.mulf %0, %31 : vector<1x32x256xf32>
    %c0_17 = arith.constant 0 : index
    %c0_18 = arith.constant 0 : index
    %c0_19 = arith.constant 0 : index
    %33 = vector.load %arg6[%c0_17, %c0_18, %c0_19] : memref<1x32x256xf32, #tpu.memory_space<vmem>>, vector<1x32x256xf32>
    tpu.vector_store %arg6[%c0_17, %c0_18, %c0_19], %32 {strides = array<i32>} : memref<1x32x256xf32, #tpu.memory_space<vmem>>, vector<1x32x256xf32>,
    return
  }
  func.func @transform_0(%arg0: i32) -> (i32, i32, i32) {
    %c0_i32 = arith.constant 0 : i32
    %c0_i32_0 = arith.constant 0 : i32
    %c0_i32_1 = arith.constant 0 : i32
    return %arg0, %c0_i32, %c0_i32_0 : i32, i32, i32
  }
  func.func @transform_1(%arg0: i32) -> (i32, i32) {
    %c0_i32 = arith.constant 0 : i32
    %c0_i32_0 = arith.constant 0 : i32
    %c0_i32_1 = arith.constant 0 : i32
    return %c0_i32, %c0_i32_0 : i32, i32
  }
  func.func @transform_2(%arg0: i32) -> (i32, i32) {
    %c0_i32 = arith.constant 0 : i32
    %c0_i32_0 = arith.constant 0 : i32
    %c0_i32_1 = arith.constant 0 : i32
    return %c0_i32, %c0_i32_0 : i32, i32
  }
  func.func @transform_3(%arg0: i32) -> (i32, i32) {
    %c0_i32 = arith.constant 0 : i32
    %c0_i32_0 = arith.constant 0 : i32
    %c0_i32_1 = arith.constant 0 : i32
    return %c0_i32, %c0_i32_0 : i32, i32
  }
  func.func @transform_4(%arg0: i32) -> (i32, i32) {
    %c0_i32 = arith.constant 0 : i32
    %c0_i32_0 = arith.constant 0 : i32
    %c0_i32_1 = arith.constant 0 : i32
    return %c0_i32, %c0_i32_0 : i32, i32
  }
  func.func @transform_5(%arg0: i32) -> (i32, i32, i32) {
    %c0_i32 = arith.constant 0 : i32
    %c0_i32_0 = arith.constant 0 : i32
    %c0_i32_1 = arith.constant 0 : i32
    return %arg0, %c0_i32, %c0_i32_0 : i32, i32, i32
  }
}

</mosaic_0001>

<bundles_post_ra>
// kernel: tpu_custom_call.1
= control target key start
LH: loop header
LB: loop body
LE: loop exit
PB: predicated region body
PF: predicated region fallthrough
CT: control target
= control target key end

     0   :  { %10 = vsyncpa [#allocation3], 0  ;;  %s936_s0 = inlined_call_operand.hbm [shape: f32[2,32,256], index: 0, kind: input, shape index: {}]   ;;  %s937_s1 = inlined_call_operand.vmem [shape: f32[32,2], index: 1, kind: input, shape index: {}]   ;;  %s938_s2 = inlined_call_operand.vmem [shape: f32[1,2], index: 2, kind: input, shape index: {}]   ;;  %s939_s3 = inlined_call_operand.vmem [shape: f32[32,2], index: 3, kind: input, shape index: {}]   ;;  %s940_s4 = inlined_call_operand.vmem [shape: f32[32,1], index: 4, kind: input, shape index: {}]   ;;  %s941_s5 = inlined_call_operand.hbm [shape: f32[2,32,256], index: 5, kind: output, shape index: {}]  }
   0x1   :  { %12 = vsyncpa [#allocation3 + $0x1], 0 }
   0x2   :  { %13 = vsyncpa [#allocation4], 0 }
   0x3   :  { %15 = vsyncpa [#allocation4 + $0x1], 0  ;;  %s691_s18 = smov 0   ;;  %s693_s19 = smov 0  }
   0x4   :  { %s695_s20 = smov 0   ;;  %s697_s21 = smov 0  }
   0x5 LB: > { %s712_s22 = sadd.s32 4294967295, %s652_s21   ;;  %s471_s23 = sadd.s32 4294967294, %s652_s21   ;;  %s652_s21 = sphi %s697_s21, %s954_s21   ;;  %s648_s20 = sphi %s695_s20, %s953_s20   ;;  %s644_s19 = sphi %s693_s19, %s952_s19   ;;  %s640_s18 = sphi %s691_s18, %s951_s18  }
   0x6   : > { %s716_s24 = sadd.s32 1, %s652_s21   ;;  %s28_s25 = sadd.s32 1, %s648_s20 }
   0x7   : > { %s25_s26 = ssub.s32 %s652_s21, %s716_s24  ;;  %p35_p0 = scmp.ne.s32.totalorder %s648_s20, %s644_s19 }
   0x8   : > { %p26_p1 = scmp.eq.s32.totalorder %s25_s26, 0  ;;  %p36_p2 = scmp.eq.s32.totalorder %s652_s21, 0 }
   0x9   : > { %p41_p3 = scmp.ne.s32.totalorder %s644_s19, %s640_s18  ;;  %p42_p4 = scmp.eq.s32.totalorder %s712_s22, 0 }
   0xa   : > { %s728_s27 = scalar_select %p26_p1, %s648_s20, %s28_s25  }
   0xb   : > { %p730_p5 = por %p36_p2, %p35_p0  ;;  %p734_p6 = por %p42_p4, %p41_p3 }
   0xc   : > { %p149_p7 = scmp.eq.s32.totalorder %s712_s22, 1  ;;  %p155_p8 = scmp.eq.s32.totalorder %s471_s23, 1 }
   0xd   : > { %p499_p10 = scmp.lt.s32.totalorder %s652_s21, 2  ;;  %s187_s7 = sand.u32 1, %s648_s20  }
   0xe   : > { %p741_p11 = por %p149_p7, %p35_p0  ;;  %p745_p12 = por %p155_p8, %p41_p3 }
   0xf   : > { %s485_s8 = sshll.u32 %s652_s21, 10  ;;  %s474_s9 = sshll.u32 %s187_s7, 6 }
  0x10   : > { %s945_s30 = scalar_select %p741_p11, 1, 0 }
  0x11   : > { %s946_s6 = scalar_select %p745_p12, 1, 0 }
  0x12   : > { %s754_s12 = scalar_lea.hbm %s936_s0, %s485_s8  ;;  %s191_s13 = scalar_lea.vmem [#allocation2], %s474_s9 }
  0x13   : > { %s198_s14 = sshll.u32 %s191_s13, 4  ;;  %p758_p13 = pnand %p499_p10, %p730_p5  ;;  %s762_s14 = int_to_ptr.vmem [resolvable:$true] %s198_s14 }
  0x14   : > { %s764_s16 = scalar_lea.sflag [#allocation3], %s187_s7  ;;  %s556_s17 = scalar_lea.hbm %s754_s12, 1024 }
  0x15   : > { %p557_p0 = scmp.ne.s32.totalorder %s754_s12, %s556_s17  ;;  %p558_p1 = pneg %p758_p13 }
  0x16   : > { %s561_s26 = scalar_lea.hbm %s936_s0, 2048  ;;  %p562_p4 = scmp.lt.u32.totalorder %s754_s12, %s936_s0 }
  0x17   : > { %p559_p2 = pnand %p558_p1, %p557_p0  ;;  %p563_p5 = scmp.lt.u32.totalorder %s561_s26, %s556_s17 }
  0x18   : > { %p565_p8 = scmp.lt.u32.totalorder %s556_s17, %s754_s12 }
  0x19   : > { %p560_p3 = pneg %p559_p2  ;;  %p564_p7 = por %p563_p5, %p562_p4 }
  0x1b   : > { %p566_p10 = por %p565_p8, %p564_p7 }
  0x1d   : > { %p567_p9 = pnand %p566_p10, %p560_p3 }
  0x1f   : > { %570 = shalt.err (!%p567_p9)
}
  0x20   : > { %s571_s7 = scalar_lea.vmem %s762_s14, 1024  ;;  %s654_s9 = smov [#allocation2]  }
  0x21   : > { %p572_p0 = scmp.ne.s32.totalorder %s762_s14, %s571_s7  ;;  %s576_s10 = sshll.u32 %s654_s9, 4  ;;  %s577_s10 = int_to_ptr.vmem [resolvable:$false] %s576_s10 }
  0x22   : > { %s578_s11 = scalar_lea.vmem %s577_s10, 2048  ;;  %p579_p11 = scmp.lt.s32.totalorder %s762_s14, %s577_s10 }
  0x23   : > { %p574_p2 = pnand %p572_p0, %p558_p1  ;;  %p580_p4 = scmp.lt.s32.totalorder %s578_s11, %s571_s7 }
  0x25   : > { %p575_p12 = pneg %p574_p2  ;;  %p581_p5 = por %p580_p4, %p579_p11 }
  0x27   : > { %p582_p7 = pnand %p581_p5, %p575_p12 }
  0x29   : > { %585 = shalt.err (!%p582_p7)
}
  0x2a   : > { %s655_s13 = smov 256   ;;  %s656_s17 = smov 16  }
  0x2b   : > { %494 = dma.hbm_to_vmem [thread:$0]  (!%p758_p13), %s754_s12, 1024, %s762_s14, %s764_s16, %s655_s13, %s655_s13, %s656_s17  }
  0x2c   : > { %p477_p9 = scmp.ge.s32.totalorder %s652_s21, 1  ;;  %p206_p1 = scmp.lt.s32.totalorder %s652_s21, 3 }
  0x2e   : > { %p207_p3 = pnand %p477_p9, %p206_p1 }
  0x2f   : > { %s795_s23 = sand.u32 (!%p207_p3), 1, %s644_s19  }
  0x30   : > { %210 = sbr.rel (%p207_p3) target bundleno = 563 (0x233), region = 40  ;;  %s478_s25 = sshll.u32 (!%p207_p3), %s795_s23, 6 }
  0x31   : > { %s213_s26 = scalar_lea.sflag (!%p207_p3), [#allocation3], %s795_s23  ;;  %s216_s28 = scalar_lea.vmem (!%p207_p3), [#allocation2], %s478_s25 }
  0x37   : > { %631 = dma.done.wait (%p734_p6), %s213_s26, 1024  }
  0x38   : > { %633 = vsyncadd (%p734_p6), %s213_s26, 4294966272  ;;  %v805_v0 = vld [vmem:[%s216_s28] sm:$0xff]  ;;  %v807_v1 = vld [vmem:[%s216_s28 + $0x8] sm:$0xff]  ;;  %vm284_vm0 = vcmask 15360   ;;  %v300_v38 = vlaneseq  ;;  %v657_v60 = vmov 0   ;;  %s242_s26 = scalar_lea.vmem [#allocation5], %s478_s25 }
  0x39   : > { %v809_v2 = vld [vmem:[%s216_s28 + $0x20] sm:$0xff]  ;;  %v251_v3 = vadd.f32 %v807_v1, %v805_v0  ;;  %v813_v4 = vld [vmem:[%s216_s28 + $0x28] sm:$0xff]  ;;  %v815_v5 = vld [vmem:[%s216_s28 + $0x10] sm:$0xff]  ;;  %539 = vset.pattern.permute.xlu1 %v657_v60  ;;  %538 = vset.pattern.permute.xlu0 %v657_v60  ;;  %s486_s29 = sshll.u32 %s712_s22, 10  ;;  %s385_s22 = scalar_lea.sflag [#allocation4], %s795_s23 }
  0x3a   : > { %v817_v6 = vld [vmem:[%s216_s28 + $0x18] sm:$0xff]  ;;  %v257_v7 = vadd.f32 %v813_v4, %v809_v2  ;;  %v821_v8 = vld [vmem:[%s216_s28 + $0x30] sm:$0xff]  ;;  %v267_v15 = vld [vmem:[%s937_s1] sm:$0xff]  ;;  %v301_v41 = vshrl.u32 %v300_v38, 7  ;;  %s890_s14 = scalar_lea.hbm %s941_s5, %s486_s29  ;;  %p948_p11 = scmp.ne.s32.totalorder %s945_s30, 0 }
  0x3b   : > { %v823_v9 = vld [vmem:[%s216_s28 + $0x38] sm:$0xff]  ;;  %252 = vadd.xlane.f32.xlu0 %v251_v3  ;;  %v254_v10 = vadd.f32 %v817_v6, %v815_v5  ;;  %v269_v17 = vld [vmem:[%s937_s1 + $0x10] sm:$0xff]  ;;  %v268_v18 = vld [vmem:[%s937_s1 + $0x8] sm:$0xff]  ;;  %s398_s28 = sshll.u32 %s242_s26, 4  ;;  %s658_s16 = smov [#allocation5]   ;;  %s885_s28 = int_to_ptr.vmem [resolvable:$true] %s398_s28 }
  0x3c   : > { %258 = vadd.xlane.f32.xlu1 %v257_v7  ;;  %v260_v11 = vadd.f32 %v823_v9, %v821_v8  ;;  %v270_v22 = vld [vmem:[%s937_s1 + $0x18] sm:$0xff]  ;;  %v275_v42 = vld [vmem:[%s938_s2] sm:$0x1]  ;;  %v302_v45 = vsub.s32 0, %v301_v41  ;;  %v272_v47 = vld [vmem:[%s939_s3 + $0x8] sm:$0xff]  ;;  %s586_s15 = scalar_lea.vmem %s885_s28, 1024 }
  0x3d   : > { %v271_v48 = vld [vmem:[%s939_s3] sm:$0xff]  ;;  %v274_v50 = vld [vmem:[%s939_s3 + $0x18] sm:$0xff]  ;;  %v273_v51 = vld [vmem:[%s939_s3 + $0x10] sm:$0xff]  ;;  %p587_p6 = scmp.ne.s32.totalorder %s885_s28, %s586_s15  ;;  %s590_s8 = sshll.u32 %s658_s16, 4  ;;  %s591_s8 = int_to_ptr.vmem [resolvable:$false] %s590_s8 }
  0x3e   : > { %v277_v61 = vld [vmem:[%s940_s4 + $0x8] sm:$0xff]  ;;  %v276_v62 = vld [vmem:[%s940_s4] sm:$0xff]  ;;  %s592_s7 = scalar_lea.vmem %s591_s8, 2048  ;;  %p593_p8 = scmp.lt.s32.totalorder %s885_s28, %s591_s8 }
  0x3f   : > { %255 = vadd.xlane.f32.xlu0 %v254_v10  ;;  %p588_p12 = pnand %p587_p6, %p948_p11  ;;  %p594_p10 = scmp.lt.s32.totalorder %s592_s7, %s586_s15 }
  0x40   : > { %261 = vadd.xlane.f32.xlu1 %v260_v11  ;;  %v279_v11 = vld [vmem:[%s940_s4 + $0x18] sm:$0xff] }
  0x41   : > { %p589_p13 = pneg %p588_p12  ;;  %p595_p0 = por %p594_p10, %p593_p8 }
  0x43   : > { %p596_p2 = pnand %p595_p0, %p589_p13 }
  0xc8   : > { %v253_v12 = vpop.xlane.xlu0 %252 }
  0xc9   : > { %v263_v13 = vmul.f32 0.00390625, %v253_v12  ;;  %v259_v14 = vpop.xlane.xlu1 %258  ;;  %v278_v12 = vld [vmem:[%s940_s4 + $0x10] sm:$0xff] }
  0xca   : > { %v265_v16 = vmul.f32 0.00390625, %v259_v14 }
  0xcb   : > { %v280_v20 = vmul.f32 %v267_v15, %v263_v13 }
  0xcc   : > { %v256_v19 = vpop.xlane.xlu0 %255  ;;  %v282_v25 = vmul.f32 %v269_v17, %v265_v16 }
  0xcd   : > { %v264_v21 = vmul.f32 0.00390625, %v256_v19  ;;  %v262_v23 = vpop.xlane.xlu1 %261  ;;  %v285_v28 = vsel %vm284_vm0, %v280_v20, 0.0 }
  0xce   : > { %v266_v24 = vmul.f32 0.00390625, %v262_v23  ;;  %v288_v31 = vsel %vm284_vm0, %v282_v25, 0.0 }
  0xcf   : > { %v281_v26 = vmul.f32 %v268_v18, %v264_v21 }
  0xd0   : > { %v283_v27 = vmul.f32 %v270_v22, %v266_v24 }
  0xd1   : > { %v286_v29 = vsel %vm284_vm0, %v281_v26, 0.0 }
  0xd2   : > { %v287_v30 = vadd.f32 %v286_v29, %v285_v28  ;;  %v290_v32 = vsel %vm284_vm0, %v283_v27, 0.0 }
  0xd4   : > { %v289_v33 = vadd.f32 %v288_v31, %v287_v30 }
  0xd6   : > { %v291_v34 = vadd.f32 %v290_v32, %v289_v33 }
  0xd8   : > { %v292_v35 = vrot.slane %v291_v34, 4 }
  0xda   : > { %v293_v36 = vadd.f32 %v292_v35, %v291_v34 }
  0xdc   : > { %v294_v37 = vrot.slane %v293_v36, 2 }
  0xde   : > { %v295_v39 = vadd.f32 %v294_v37, %v293_v36 }
  0xe0   : > { %v296_v40 = vrot.slane %v295_v39, 1 }
  0xe2   : > { %v297_v43 = vadd.f32 %v296_v40, %v295_v39 }
  0xe4   : > { %v298_v44 = vadd.f32 %v297_v43, %v275_v42 }
  0xe6   : > { %v299_v46 = vmax.f32 %v298_v44, 0.0 }
  0xe8   : > { %v303_v49 = vrot.slane %v299_v46, %v302_v45 }
  0xea   : > { %v305_v52 = vmul.f32 %v303_v49, %v272_v47  ;;  %v304_v53 = vmul.f32 %v303_v49, %v271_v48  ;;  %v307_v56 = vmul.f32 %v303_v49, %v274_v50  ;;  %v306_v57 = vmul.f32 %v303_v49, %v273_v51 }
  0xec   : > { %v311_v54 = vsel %vm284_vm0, %v305_v52, 0.0  ;;  %v308_v55 = vsel %vm284_vm0, %v304_v53, 0.0  ;;  %v317_v58 = vsel %vm284_vm0, %v307_v56, 0.0  ;;  %v314_v59 = vsel %vm284_vm0, %v306_v57, 0.0 }
  0xed   : > { %312 = vadd.xlane.f32.xlu1 %v311_v54  ;;  %309 = vadd.xlane.f32.xlu0 %v308_v55 }
  0xf1   : > { %318 = vadd.xlane.f32.xlu1 %v317_v58  ;;  %315 = vadd.xlane.f32.xlu0 %v314_v59 }
 0x17a   : > { %v313_v63 = vpop.xlane.xlu1 %312  ;;  %v310_v3 = vpop.xlane.xlu0 %309 }
 0x17b   : > { %v321_v7 = vadd.f32 %v313_v63, %v277_v61  ;;  %v320_v10 = vadd.f32 %v310_v3, %v276_v62 }
 0x17d   : > { %v325_v13 = vsub.f32 0.0, %v321_v7  ;;  %v324_v14 = vsub.f32 0.0, %v320_v10 }
 0x17e   : > { %v319_v15 = vpop.xlane.xlu1 %318  ;;  %v316_v16 = vpop.xlane.xlu0 %315 }
 0x17f   : > { %v330_v17 = vmul.f32 1.442695, %v325_v13  ;;  %v328_v18 = vmul.f32 1.442695, %v324_v14  ;;  %v323_v19 = vadd.f32 %v319_v15, %v279_v11  ;;  %v322_v20 = vadd.f32 %v316_v16, %v278_v12 }
 0x181   : > { %540 = vpow2.f32 %v330_v17  ;;  %v327_v21 = vsub.f32 0.0, %v323_v19  ;;  %v326_v22 = vsub.f32 0.0, %v322_v20 }
 0x182   : > { %542 = vpow2.f32 %v328_v18 }
 0x183   : > { %v334_v23 = vmul.f32 1.442695, %v327_v21  ;;  %v332_v24 = vmul.f32 1.442695, %v326_v22 }
 0x185   : > { %544 = vpow2.f32 %v334_v23 }
 0x186   : > { %546 = vpow2.f32 %v332_v24 }
 0x18b   : > { %v541_v25 = vpop.eup %540 }
 0x18c   : > { %v543_v26 = vpop.eup %542  ;;  %v337_v27 = vadd.f32 1.0, %v541_v25 }
 0x18d   : > { %v336_v28 = vadd.f32 1.0, %v543_v26 }
 0x18e   : > { %548 = vrcp.f32 %v337_v27 }
 0x18f   : > { %v545_v29 = vpop.eup %544  ;;  %550 = vrcp.f32 %v336_v28 }
 0x190   : > { %v547_v30 = vpop.eup %546  ;;  %v339_v32 = vadd.f32 1.0, %v545_v29 }
 0x191   : > { %v338_v31 = vadd.f32 1.0, %v547_v30 }
 0x193   : > { %552 = vrcp.f32 %v338_v31 }
 0x194   : > { %554 = vrcp.f32 %v339_v32 }
 0x198   : > { %v549_v33 = vpop.eup %548 }
 0x199   : > { %v551_v34 = vpop.eup %550  ;;  %355 = vperm.xlu1 %539, %v549_v33  }
 0x19a   : > { %350 = vperm.xlu0 %538, %v551_v34  }
 0x19d   : > { %v553_v35 = vpop.eup %552 }
 0x19e   : > { %360 = vperm.xlu1 %539, %v553_v35   ;;  %v555_v36 = vpop.eup %554 }
 0x1a2   : > { %365 = vperm.xlu1 %539, %v555_v36  }
 0x218   : > { %v356_v37 = vpop.permute.xlu1 %355 }
 0x219   : > { %v370_v38 = vmul.f32 %v356_v37, %v815_v5  ;;  %v371_v39 = vmul.f32 %v356_v37, %v817_v6  ;;  %v351_v40 = vpop.permute.xlu0 %350 }
 0x21a   : > { %v368_v41 = vmul.f32 %v351_v40, %v805_v0  ;;  %v369_v42 = vmul.f32 %v351_v40, %v807_v1 }
 0x21b   : > { %378 = vst [vmem:[%s242_s26 + $0x10] sm:$0xff] %v370_v38  ;;  %379 = vst [vmem:[%s242_s26 + $0x18] sm:$0xff] %v371_v39 }
 0x21c   : > { %376 = vst [vmem:[%s242_s26] sm:$0xff] %v368_v41  ;;  %377 = vst [vmem:[%s242_s26 + $0x8] sm:$0xff] %v369_v42 }
 0x21d   : > { %v361_v43 = vpop.permute.xlu1 %360 }
 0x21e   : > { %v372_v44 = vmul.f32 %v361_v43, %v809_v2  ;;  %v373_v5 = vmul.f32 %v361_v43, %v813_v4 }
 0x220   : > { %380 = vst [vmem:[%s242_s26 + $0x20] sm:$0xff] %v372_v44  ;;  %381 = vst [vmem:[%s242_s26 + $0x28] sm:$0xff] %v373_v5 }
 0x221   : > { %v366_v0 = vpop.permute.xlu1 %365 }
 0x222   : > { %v374_v1 = vmul.f32 %v366_v0, %v821_v8  ;;  %v375_v2 = vmul.f32 %v366_v0, %v823_v9 }
 0x224   : > { %382 = vst [vmem:[%s242_s26 + $0x30] sm:$0xff] %v374_v1  ;;  %383 = vst [vmem:[%s242_s26 + $0x38] sm:$0xff] %v375_v2 }
 0x225   : > { %599 = shalt.err (!%p596_p2)
}
 0x226   : > { %s600_s9 = scalar_lea.hbm %s890_s14, 1024  ;;  %s604_s13 = scalar_lea.hbm %s941_s5, 2048 }
 0x227   : > { %p601_p4 = scmp.ne.s32.totalorder %s890_s14, %s600_s9  ;;  %p605_p9 = scmp.lt.u32.totalorder %s890_s14, %s941_s5 }
 0x228   : > { %p606_p1 = scmp.lt.u32.totalorder %s604_s13, %s600_s9  ;;  %p608_p6 = scmp.lt.u32.totalorder %s600_s9, %s890_s14 }
 0x229   : > { %p602_p5 = pnand %p601_p4, %p948_p11 }
 0x22a   : > { %p607_p3 = por %p606_p1, %p605_p9 }
 0x22b   : > { %p603_p7 = pneg %p602_p5 }
 0x22c   : > { %p609_p12 = por %p608_p6, %p607_p3 }
 0x22e   : > { %p610_p13 = pnand %p609_p12, %p603_p7 }
 0x230   : > { %613 = shalt.err (!%p610_p13)
}
 0x231   : > { %s659_s29 = smov 256   ;;  %s660_s25 = smov 16  }
 0x232   : > { %489 = dma.vmem_to_hbm [thread:$0]  (%p948_p11), %s885_s28, 1024, %s890_s14, %s385_s22, %s659_s29, %s659_s29, %s660_s25  }
 0x233 PF: > { %s413_s12 = sand.u32 1, %s640_s18   ;;  %p949_p8 = scmp.ne.s32.totalorder %s946_s6, 0 }
 0x234   : > { %p950_p10 = scmp.ge.s32.totalorder %s652_s21, 2  ;;  %s414_s15 = scalar_lea.sflag [#allocation4], %s413_s12 }
 0x236   : > { %p496_p0 = pnand %p950_p10, %p949_p8 }
 0x238   : > { %635 = dma.done.wait (!%p496_p0), %s414_s15, 1024  }
 0x239   : > { %637 = vsyncadd (!%p496_p0), %s414_s15, 4294966272  ;;  %p18_p2 = scmp.ge.s32.totalorder %s716_s24, 4   ;;  %s951_s18 = smov %s644_s19 }
 0x23a   : > { %s952_s19 = smov %s648_s20  ;;  %s953_s20 = smov %s728_s27 }
 0x23b   : > { %s954_s21 = smov %s716_s24  ;;  %20 = sbr.rel (!%p18_p2) target bundleno = 5 (0x5), region = 85 }
 0x242   :  { %419 = vsyncpa [#allocation3], 1 }
 0x243   :  { %421 = vsyncpa [#allocation3 + $0x1], 1 }
 0x244   :  { %422 = vsyncpa [#allocation4], 1 }
 0x245   :  { %424 = vsyncpa [#allocation4 + $0x1], 1 }

</bundles_post_ra>
